<compile_context>
chip_gen: v7x
topology: tpu7x:2x2x1
jax: 0.10.0
libtpu: 0.0.40
codegen_flags: <defaults>
</compile_context>

<pallas_src>
import jax
import jax.numpy as jnp
from jax.experimental import pallas as pl
from jax.experimental.pallas import tpu as pltpu

CLAMP_MIN = 0.0
CLAMP_MAX = 1.0


def conv_clamp_max_kernel(w_ref, p_ref, x2_ref, o_ref):
    # One MXU matmul (Cout, Kdim+1) @ (Kdim+1, Mpad) in f32 — the bias rides along
    # as a ones row of the patch matrix — then a fused VPU epilogue:
    # clamp_min -> clamp_max -> max(x2), stored as a full-width lane-dense block.
    acc = jnp.dot(w_ref[...], p_ref[...], preferred_element_type=jnp.float32)
    acc = jnp.clip(acc, CLAMP_MIN, CLAMP_MAX)
    o_ref[...] = jnp.maximum(acc, x2_ref[...]).astype(o_ref.dtype)


def model_forward(x1, x2, weight, bias):
    """x1: (N, Cin, H, W) f32, x2: (N, Cout, Hout, Wout) f32,
    weight: (Cout, Cin, Kh, Kw), bias: (Cout,). Returns NCHW like PyTorch."""
    # TODO(synk): torch.max broadcasting for x2 shapes other than the exact
    # conv-output shape is not handled (the spec's own x2 shape is incompatible).
    N, Cin, H, W = x1.shape
    Cout, _, Kh, Kw = weight.shape
    pad = 1
    Hout = H + 2 * pad - Kh + 1
    Wout = W + 2 * pad - Kw + 1
    Kdim = Kh * Kw * Cin
    M = N * Hout * Wout

    LANE = 128
    Mpad = ((M + LANE - 1) // LANE) * LANE

    # ---- wrapper glue (small, fused by XLA): transposed im2col + bias row ----
    xp = jnp.pad(x1, ((0, 0), (0, 0), (pad, pad), (pad, pad)))   # (N,Cin,Hp,Wp)
    pieces = [
        xp[:, :, kh:kh + Hout, kw:kw + Wout]                     # (N,Cin,Hout,Wout)
        .transpose(1, 0, 2, 3).reshape(Cin, M)                   # lane-dense (Cin, M)
        for kh in range(Kh) for kw in range(Kw)
    ]
    pieces.append(jnp.ones((1, M), x1.dtype))                    # bias ones-row
    PTb = jnp.concatenate(pieces, axis=0)                        # (Kdim+1, M), rows (kh,kw,ci)+1

    # weight (Cout,Cin,Kh,Kw) -> (Cout, kh*Kw*Cin + kw*Cin + ci), bias as last column
    W2T = weight.transpose(0, 2, 3, 1).reshape(Cout, Kdim)
    W2Tb = jnp.concatenate([W2T, bias.reshape(Cout, 1)], axis=1)  # (Cout, Kdim+1)

    # x2 in the same transposed lane-dense layout (no lane pad; tail lanes unused)
    x2T = x2.transpose(1, 0, 2, 3).reshape(Cout, M)              # (Cout, M)

    outT = pl.pallas_call(
        conv_clamp_max_kernel,
        out_shape=jax.ShapeDtypeStruct((Cout, Mpad), jnp.float32),
        grid=(1,),                                               # single VMEM-resident block
        in_specs=[
            pl.BlockSpec((Cout, Kdim + 1), lambda i: (0, 0)),    # weights+bias (8, 13)
            pl.BlockSpec((Kdim + 1, Mpad), lambda i: (0, 0)),    # patches^T (13, 640) partial
            pl.BlockSpec((Cout, Mpad), lambda i: (0, 0)),        # x2^T (8, 640) partial
        ],
        out_specs=pl.BlockSpec((Cout, Mpad), lambda i: (0, 0)),  # full-width stores
        compiler_params=pltpu.CompilerParams(
            dimension_semantics=("arbitrary",)),
    )(W2Tb, PTb, x2T)

    out = outT[:, :M].reshape(Cout, N, Hout, Wout)               # drop garbage tail lanes
    return out.transpose(1, 0, 2, 3)                             # back to NCHW


if __name__ == "__main__":
    key = jax.random.PRNGKey(0)
    k1, k2, k3, k4 = jax.random.split(key, 4)

    # Small shapes consistent with the module: Conv2d(3 -> 8, kernel 2, pad 1)
    N, Cin, H, W = 2, 3, 16, 16
    Cout, Kh, Kw = 8, 2, 2
    Hout, Wout = H + 1, W + 1          # pad=1, k=2, stride=1

    x1 = jax.random.normal(k1, (N, Cin, H, W), dtype=jnp.float32)
    # x2 must be broadcast-compatible with the conv output for torch.max:
    x2 = jax.random.normal(k2, (N, Cout, Hout, Wout), dtype=jnp.float32)

    # Deterministic parameter init (synthetic, no checkpoint)
    fan_in = Cin * Kh * Kw
    weight = jax.random.normal(k3, (Cout, Cin, Kh, Kw), dtype=jnp.float32) / jnp.sqrt(fan_in)
    bias = jax.random.normal(k4, (Cout,), dtype=jnp.float32) * 0.1

    fwd = jax.jit(model_forward)
    out = fwd(x1, x2, weight, bias)
    out = jax.block_until_ready(out)

    # Sanity check against the XLA reference path
    ref_conv = jax.lax.conv_general_dilated(
        x1, weight, window_strides=(1, 1), padding=((1, 1), (1, 1)),
        dimension_numbers=("NCHW", "OIHW", "NCHW")) + bias.reshape(1, -1, 1, 1)
    ref = jnp.maximum(jnp.clip(ref_conv, CLAMP_MIN, CLAMP_MAX), x2)
    assert out.shape == (N, Cout, Hout, Wout)
    assert jnp.allclose(out, ref, atol=1e-5, rtol=1e-5)

    print("KERNEL_OK")
</pallas_src>

<mosaic_0001>
module attributes {stable_mosaic.version = 11 : i64} {
  func.func @conv_clamp_max_kernel(%arg0: i32, %arg1: memref<8x13xf32, #tpu.memory_space<vmem>>, %arg2: memref<13x640xf32, #tpu.memory_space<vmem>>, %arg3: memref<8x640xf32, #tpu.memory_space<vmem>>, %arg4: memref<8x640xf32, #tpu.memory_space<vmem>>) attributes {dimension_semantics = [#tpu.dimension_semantics<arbitrary>], iteration_bounds = array<i64: 1>, scalar_prefetch = 0 : i64, scratch_operands = 0 : i64, tpu.core_type = #tpu.core_type<tc>, window_params = [{pipeline_mode = #tpu.pipeline_mode<synchronous>, transform_indices = @transform_0, window_bounds = array<i64: 8, 13>}, {transform_indices = @transform_1, window_bounds = array<i64: 13, 640>}, {transform_indices = @transform_2, window_bounds = array<i64: 8, 640>}, {pipeline_mode = #tpu.pipeline_mode<synchronous>, transform_indices = @transform_3, window_bounds = array<i64: 8, 640>}]} {
    %c0 = arith.constant 0 : index
    %c0_0 = arith.constant 0 : index
    %0 = vector.load %arg1[%c0, %c0_0] : memref<8x13xf32, #tpu.memory_space<vmem>>, vector<8x13xf32>
    %c0_1 = arith.constant 0 : index
    %c0_2 = arith.constant 0 : index
    %1 = vector.load %arg2[%c0_1, %c0_2] : memref<13x640xf32, #tpu.memory_space<vmem>>, vector<13x640xf32>
    %cst = arith.constant dense<0.000000e+00> : vector<8x640xf32>
    %2 = tpu.matmul %0, %1, %cst {dimension_numbers = #tpu.dot_dimension_numbers<[1], [0], [0], [1], [0, 0, 1, 1], [], []>} : vector<8x13xf32>, vector<13x640xf32>, vector<8x640xf32> -> vector<8x640xf32>
    %cst_3 = arith.constant 0.000000e+00 : f32
    %cst_4 = arith.constant 1.000000e+00 : f32
    %3 = vector.broadcast %cst_3 : f32 to vector<8x640xf32>
    %4 = arith.maximumf %3, %2 : vector<8x640xf32>
    %5 = vector.broadcast %cst_4 : f32 to vector<8x640xf32>
    %6 = arith.minimumf %5, %4 : vector<8x640xf32>
    %c0_5 = arith.constant 0 : index
    %c0_6 = arith.constant 0 : index
    %7 = vector.load %arg3[%c0_5, %c0_6] : memref<8x640xf32, #tpu.memory_space<vmem>>, vector<8x640xf32>
    %8 = arith.maximumf %6, %7 : vector<8x640xf32>
    %c0_7 = arith.constant 0 : index
    %c0_8 = arith.constant 0 : index
    %9 = vector.load %arg4[%c0_7, %c0_8] : memref<8x640xf32, #tpu.memory_space<vmem>>, vector<8x640xf32>
    tpu.vector_store %arg4[%c0_7, %c0_8], %8 {strides = array<i32>} : memref<8x640xf32, #tpu.memory_space<vmem>>, vector<8x640xf32>,
    return
  }
  func.func @transform_0(%arg0: i32) -> (i32, i32) {
    %c0_i32 = arith.constant 0 : i32
    %c0_i32_0 = arith.constant 0 : i32
    %c0_i32_1 = arith.constant 0 : i32
    return %c0_i32, %c0_i32_0 : i32, i32
  }
  func.func @transform_1(%arg0: i32) -> (i32, i32) {
    %c0_i32 = arith.constant 0 : i32
    %c0_i32_0 = arith.constant 0 : i32
    %c0_i32_1 = arith.constant 0 : i32
    return %c0_i32, %c0_i32_0 : i32, i32
  }
  func.func @transform_2(%arg0: i32) -> (i32, i32) {
    %c0_i32 = arith.constant 0 : i32
    %c0_i32_0 = arith.constant 0 : i32
    %c0_i32_1 = arith.constant 0 : i32
    return %c0_i32, %c0_i32_0 : i32, i32
  }
  func.func @transform_3(%arg0: i32) -> (i32, i32) {
    %c0_i32 = arith.constant 0 : i32
    %c0_i32_0 = arith.constant 0 : i32
    %c0_i32_1 = arith.constant 0 : i32
    return %c0_i32, %c0_i32_0 : i32, i32
  }
}

</mosaic_0001>

<bundles_post_ra>
// kernel: model_forward.1
= control target key start
LH: loop header
LB: loop body
LE: loop exit
PB: predicated region body
PF: predicated region fallthrough
CT: control target
= control target key end

     0   :  { %vm29_vm0 = vcmask 1044480   ;;  %vm324_vm1 = vmmov 1   ;;  %v325_v3 = vmov 0.0   ;;  %vm25_vm3 = vcmask 105472   ;;  %s425_s1 = inlined_call_operand.vmem [shape: f32[13,578], index: 1, kind: input, shape index: {}]   ;;  %s426_s0 = inlined_call_operand.vmem [shape: f32[8,13], index: 0, kind: input, shape index: {}]   ;;  %s427_s2 = inlined_call_operand.vmem [shape: f32[8,578], index: 2, kind: input, shape index: {}]   ;;  %s428_s3 = inlined_call_operand.vmem [shape: f32[8,640], index: 3, kind: output, shape index: {}]  }
   0x1   :  { %v16_v0 = vld [vmem:[%s425_s1 + $0x8] sm:$0xff]  ;;  %v21_v1 = vld [vmem:[%s425_s1 + $0x30] sm:$0x1f]  ;;  %vm354_vm2 = vmpackc.low %vm29_vm0, %vm324_vm1  ;;  %109 = vmatprep.mubr.f32.mxu0 %v325_v3  ;;  %180 = vmatprep.mubr.f32.mxu1 %v325_v3  ;;  %v326_v18 = vmov 0.0|0.0   ;;  %vm327_vm4 = vmmov 0  }
   0x2   :  { %v304_v4 = vpack.c.bf16 %v21_v1, %v16_v0  ;;  %v15_v5 = vld [vmem:[%s425_s1] sm:$0xff]  ;;  %v20_v6 = vld [vmem:[%s425_s1 + $0x28] sm:$0x1f]  ;;  %v18_v7 = vld [vmem:[%s425_s1 + $0x18] sm:$0xff] }
   0x3   :  { %v307_v8 = vpack.c.bf16 %v20_v6, %v15_v5  ;;  %v23_v9 = vld [vmem:[%s425_s1 + $0x40] sm:$0x1f]  ;;  %v17_v10 = vld [vmem:[%s425_s1 + $0x10] sm:$0xff]  ;;  %v22_v12 = vld [vmem:[%s425_s1 + $0x38] sm:$0x1f] }
   0x4   :  { %306 = vmatprep.subr.msk.bf16.mxu0 %vm354_vm2, %v304_v4  ;;  %v310_v11 = vpack.c.bf16 %v23_v9, %v18_v7  ;;  %v19_v13 = vld [vmem:[%s425_s1 + $0x20] sm:$0xff]  ;;  %v24_v14 = vld [vmem:[%s425_s1 + $0x48] sm:$0x1f]  ;;  %v313_v16 = vpack.c.bf16 %v22_v12, %v17_v10  ;;  %v269_v30 = vld [vmem:[%s427_s2 + $0x10] sm:$0xff] }
   0x5   :  { %309 = vmatpush1.bf16.msk.msra.mxu0 %vm354_vm2, %v307_v8  ;;  %v14_v15 = vld [vmem:[%s426_s0] sm:$0xff]  ;;  %v317_v17 = vpack.c.bf16 %v24_v14, %v19_v13  ;;  %v268_v26 = vld [vmem:[%s427_s2 + $0x8] sm:$0xff]  ;;  %v270_v35 = vld [vmem:[%s427_s2 + $0x18] sm:$0xff] }
   0x6   :  { %312 = vmatprep.subr.msk.bf16.mxu1 %vm354_vm2, %v310_v11  ;;  %316 = vmatprep.subr.bf16.mxu0 %v326_v18  ;;  %v267_v22 = vld [vmem:[%s427_s2] sm:$0xff] }
   0x7   :  { %315 = vmatpush1.bf16.msk.msra.mxu1 %vm354_vm2, %v313_v16  ;;  %v271_v40 = vld [vmem:[%s427_s2 + $0x20] sm:$0xff] }
   0x8   :  { %288 = vmatmul.mubr.msk.f32.vlgmr.msra.gmra.mrb[0].mxu0 %vm25_vm3, %v14_v15 }
   0x9   :  { %319 = vmatpush3.bf16.msk.msra.mxu0 %vm354_vm2, %v317_v17  ;;  %301 = vmatprep.mubr.msk.f32.mxu0 %vm327_vm4, %v325_v3 }
   0xa   :  { %291 = vmatmul.mubr.msk.f32.vlgmr.msra.gmra.mrb[0].mxu1 %vm25_vm3, %v14_v15 }
   0xc   :  { %302 = vmatmul.mubr.msk.f32.vlgmr.msra.gmra.mrb[2].mxu0 %vm25_vm3, %v14_v15 }
  0xdb   :  { %v111_v19 = vpop.f32.mrb[0].mxu0 }
  0xdc   :  { %v257_v20 = vmax.f32 %v111_v19, 0.0  ;;  %v113_v21 = vpop.f32.mrb[1].mxu0 }
  0xdd   :  { %v258_v23 = vmax.f32 %v113_v21, 0.0  ;;  %v182_v24 = vpop.f32.mrb[0].mxu1 }
  0xde   :  { %v262_v25 = vmin.f32 %v257_v20, 1.0  ;;  %v259_v27 = vmax.f32 %v182_v24, 0.0  ;;  %v184_v28 = vpop.f32.mrb[1].mxu1 }
  0xdf   :  { %v263_v29 = vmin.f32 %v258_v23, 1.0  ;;  %v260_v31 = vmax.f32 %v184_v28, 0.0  ;;  %v253_v32 = vpop.f32.mrb[2].mxu0 }
  0xe0   :  { %v272_v33 = vmax.f32 %v262_v25, %v267_v22  ;;  %v264_v34 = vmin.f32 %v259_v27, 1.0  ;;  %v261_v36 = vmax.f32 %v253_v32, 0.0  ;;  %v303_v37 = vpop.f32.mrb[3].mxu0 }
  0xe1   :  { %v273_v38 = vmax.f32 %v263_v29, %v268_v26  ;;  %v265_v39 = vmin.f32 %v260_v31, 1.0 }
  0xe2   :  { %277 = vst [vmem:[%s428_s3] sm:$0xff] %v272_v33  ;;  %v274_v41 = vmax.f32 %v264_v34, %v269_v30  ;;  %v266_v42 = vmin.f32 %v261_v36, 1.0 }
  0xe3   :  { %278 = vst [vmem:[%s428_s3 + $0x8] sm:$0xff] %v273_v38  ;;  %v275_v43 = vmax.f32 %v265_v39, %v270_v35 }
  0xe4   :  { %279 = vst [vmem:[%s428_s3 + $0x10] sm:$0xff] %v274_v41  ;;  %v276_v44 = vmax.f32 %v266_v42, %v271_v40 }
  0xe5   :  { %280 = vst [vmem:[%s428_s3 + $0x18] sm:$0xff] %v275_v43 }
  0xe6   :  { %281 = vst [vmem:[%s428_s3 + $0x20] sm:$0xff] %v276_v44 }

</bundles_post_ra>
